<compile_context>
chip_gen: v7x
topology: tpu7x:2x2x1
jax: 0.10.0
libtpu: 0.0.40
codegen_flags: <defaults>
</compile_context>

<pallas_src>
import functools

import jax
import jax.numpy as jnp
import numpy as np
from jax.experimental import pallas as pl
from jax.experimental.pallas import tpu as pltpu


def _round_up(x, m):
    return (x + m - 1) // m * m


def ldam_kernel(x_ref, tgt_ref, m_ref, *rest, s, has_weight):
    """One grid step: per-sample LDAM cross-entropy on a (tile_n, C) slab.

    x_ref   : (tile_n, C) VMEM  -- raw logits (any float dtype, upcast here)
    tgt_ref : (tile_n, 1) i32 VMEM -- class indices
    m_ref   : (1, C) f32 VMEM   -- LDAM per-class margins
    rest (weighted)  : w_ref (1, C), num_ref (tile_n, 1), den_ref (tile_n, 1)
    rest (unweighted): num_ref (tile_n, 1)
    """
    if has_weight:
        w_ref, num_ref, den_ref = rest
    else:
        (num_ref,) = rest

    x = x_ref[...].astype(jnp.float32)                   # (tile_n, C)
    t = tgt_ref[...]                                     # (tile_n, 1) int32
    m = m_ref[...].astype(jnp.float32)                   # (1, C)

    # one_hot(label) built in-kernel: lane iota vs target index
    col = jax.lax.broadcasted_iota(jnp.int32, x.shape, 1)
    one_hot = (col == t).astype(jnp.float32)             # (tile_n, C)

    # output = where(index, x - m_list[y], x); since one_hot selects exactly
    # the target column, one_hot * m_list[y] == one_hot * m_list -> no gather.
    z = s * (x - one_hot * m)                             # (tile_n, C)

    # stable cross-entropy: nll_i = logsumexp(z_i) - z_i[y_i]
    z_max = jnp.max(z, axis=-1, keepdims=True)
    lse = z_max + jnp.log(jnp.sum(jnp.exp(z - z_max), axis=-1, keepdims=True))
    tgt_logit = jnp.sum(one_hot * z, axis=-1, keepdims=True)
    nll = lse - tgt_logit                                  # (tile_n, 1)

    if has_weight:
        w = w_ref[...].astype(jnp.float32)                 # (1, C)
        w_i = jnp.sum(one_hot * w, axis=-1, keepdims=True)  # (tile_n, 1)
        num_ref[...] = w_i * nll
        den_ref[...] = w_i
    else:
        num_ref[...] = nll


def _derive_tile_n(n, c, in_itemsize, sublane):
    # Per-row VMEM footprint: double-buffered logits block + ~6 f32 temps
    # (upcast x, one_hot, z, exp, ...).  Target ~24 MiB of block-scoped VMEM.
    bytes_per_row = 2 * c * in_itemsize + 6 * c * 4
    budget = 24 * 1024 * 1024
    tile_n = budget // bytes_per_row
    tile_n = min(tile_n, 1024, _round_up(n, sublane))
    tile_n = max(sublane, tile_n // sublane * sublane)
    return int(tile_n)


def ldam_loss(x, label, m_list, weight=None, *, s=30.0, tile_n=None):
    """Pallas implementation of LDAMLoss.forward.

    x      : [N, C] float logits (f32 or bf16)
    label  : [N]    int class indices
    m_list : [C]    float margins (as computed in LDAMLoss.__init__)
    weight : [C]    optional per-class CE weights (None before reset_epoch)
    returns: scalar float32 loss
    """
    n, c = x.shape
    in_itemsize = jnp.dtype(x.dtype).itemsize
    sublane = max(8, 32 // in_itemsize)        # 8 f32 / 16 bf16 / 32 int8
    if tile_n is None:
        tile_n = _derive_tile_n(n, c, in_itemsize, sublane)
    else:
        tile_n = max(sublane, _round_up(int(tile_n), sublane))
        tile_n = min(tile_n, _round_up(n, sublane))
    grid = pl.cdiv(n, tile_n)
    n_pad = grid * tile_n

    has_weight = weight is not None
    tgt2d = label.astype(jnp.int32).reshape(n, 1)
    m2d = m_list.astype(jnp.float32).reshape(1, c)

    kernel = functools.partial(ldam_kernel, s=float(s), has_weight=has_weight)

    in_specs = [
        pl.BlockSpec((tile_n, c), lambda i: (i, 0)),   # logits tile
        pl.BlockSpec((tile_n, 1), lambda i: (i, 0)),   # targets tile
        pl.BlockSpec((1, c), lambda i: (0, 0)),        # margins (resident)
    ]
    args = [x, tgt2d, m2d]
    row_spec = pl.BlockSpec((tile_n, 1), lambda i: (i, 0))
    if has_weight:
        in_specs.append(pl.BlockSpec((1, c), lambda i: (0, 0)))  # weights
        args.append(weight.astype(jnp.float32).reshape(1, c))
        out_shape = (jax.ShapeDtypeStruct((n_pad, 1), jnp.float32),
                     jax.ShapeDtypeStruct((n_pad, 1), jnp.float32))
        out_specs = (row_spec, row_spec)
    else:
        out_shape = jax.ShapeDtypeStruct((n_pad, 1), jnp.float32)
        out_specs = row_spec

    # Explicit VMEM limit so the derived tile fits the default scoped limits
    # (16/32/32 MiB on v5e/v6e/v7x) regardless of generation.
    est_bytes = (2 * tile_n * c * in_itemsize      # double-buffered logits
                 + 6 * tile_n * c * 4              # f32 temporaries
                 + 4 * tile_n * 512                # lane-padded i32 targets + outputs
                 + 4 * c * 4)                      # (1,C) margins/weights
    vmem_limit = int(min(48 * 1024 * 1024,
                         max(32 * 1024 * 1024, est_bytes * 5 // 4)))

    out = pl.pallas_call(
        kernel,
        out_shape=out_shape,
        grid_spec=pltpu.PrefetchScalarGridSpec(
            num_scalar_prefetch=0,
            grid=(grid,),
            in_specs=in_specs,
            out_specs=out_specs,
        ),
        compiler_params=pltpu.CompilerParams(
            dimension_semantics=("parallel",),     # no carried state -> megacore
            vmem_limit_bytes=vmem_limit,
        ),
    )(*args)

    # Final reduction / weighted mean in JAX (tiny vs. streaming the logits).
    # Padded rows (>= n) may hold garbage and are sliced off before the sum.
    if has_weight:
        num, den = out
        return (jnp.sum(num[:n]) / jnp.sum(den[:n])).reshape(())
    return (jnp.sum(out[:n]) / n).reshape(())


def ldam_loss_ref(x, label, m_list, weight=None, *, s=30.0):
    """Pure-JAX reference mirroring the PyTorch module."""
    c = x.shape[1]
    xf = x.astype(jnp.float32)
    one_hot = jax.nn.one_hot(label, c, dtype=jnp.float32)
    batch_m = (one_hot @ m_list.astype(jnp.float32)).reshape(-1, 1)
    output = jnp.where(one_hot > 0, xf - batch_m, xf)
    logp = jax.nn.log_softmax(s * output, axis=-1)
    per = -jnp.sum(one_hot * logp, axis=-1)
    if weight is None:
        return jnp.mean(per)
    w = weight[label]
    return jnp.sum(w * per) / jnp.sum(w)


if __name__ == "__main__":
    num_classes = 32
    batch = 24
    s = 30.0
    max_m = 0.5

    key = jax.random.PRNGKey(0)
    k_x, k_y, k_cnt = jax.random.split(key, 3)

    # per-class sample counts -> LDAM margins (host-side, as in __init__)
    num_class_list = np.asarray(
        jax.random.randint(k_cnt, (num_classes,), 10, 1000, dtype=jnp.int32)
    ).astype(np.float64)
    m_np = 1.0 / np.sqrt(np.sqrt(num_class_list))
    m_np = m_np * (max_m / np.max(m_np))
    m_list = jnp.asarray(m_np, dtype=jnp.float32)

    # DRW per-class weights (as reset_epoch with beta = 0.9999)
    beta = 0.9999
    eff = 1.0 - np.power(beta, num_class_list)
    w_np = (1.0 - beta) / eff
    w_np = w_np / np.sum(w_np) * num_classes
    drw_weight = jnp.asarray(w_np, dtype=jnp.float32)

    x = jax.random.normal(k_x, (batch, num_classes), dtype=jnp.float32)
    label = jax.random.randint(k_y, (batch,), 0, num_classes, dtype=jnp.int32)

    # f32 logits: unweighted + DRW-weighted, default tile and ragged tiles
    for w in (None, drw_weight):
        ref = jax.block_until_ready(ldam_loss_ref(x, label, m_list, w, s=s))
        for tn in (None, 8, 16):  # default single tile, multi-tile, ragged last tile
            got = jax.block_until_ready(
                ldam_loss(x, label, m_list, w, s=s, tile_n=tn)
            )
            assert jnp.allclose(got, ref, rtol=1e-4, atol=1e-4), (tn, got, ref)

    # bf16 logits path (halved HBM traffic; upcast inside the kernel)
    x_bf = x.astype(jnp.bfloat16)
    ref_bf = jax.block_until_ready(
        ldam_loss_ref(x_bf.astype(jnp.float32), label, m_list, None, s=s)
    )
    got_bf = jax.block_until_ready(ldam_loss(x_bf, label, m_list, None, s=s))
    assert jnp.allclose(got_bf, ref_bf, rtol=1e-4, atol=1e-4), (got_bf, ref_bf)

    print("KERNEL_OK")
</pallas_src>

<mosaic_0001>
module attributes {stable_mosaic.version = 11 : i64} {
  func.func @ldam_kernel(%arg0: i32, %arg1: memref<24x32xf32, #tpu.memory_space<vmem>>, %arg2: memref<24x1xi32, #tpu.memory_space<vmem>>, %arg3: memref<1x32xf32, #tpu.memory_space<vmem>>, %arg4: memref<24x1xf32, #tpu.memory_space<vmem>>) attributes {dimension_semantics = [#tpu.dimension_semantics<parallel>], iteration_bounds = array<i64: 1>, scalar_prefetch = 0 : i64, scratch_operands = 0 : i64, tpu.core_type = #tpu.core_type<tc>, window_params = [{transform_indices = @transform_0, window_bounds = array<i64: 24, 32>}, {transform_indices = @transform_1, window_bounds = array<i64: 24, 1>}, {pipeline_mode = #tpu.pipeline_mode<synchronous>, transform_indices = @transform_2, window_bounds = array<i64: 1, 32>}, {transform_indices = @transform_3, window_bounds = array<i64: 24, 1>}]} {
    %c0 = arith.constant 0 : index
    %c0_0 = arith.constant 0 : index
    %0 = vector.load %arg1[%c0, %c0_0] : memref<24x32xf32, #tpu.memory_space<vmem>>, vector<24x32xf32>
    %c0_1 = arith.constant 0 : index
    %c0_2 = arith.constant 0 : index
    %1 = vector.load %arg2[%c0_1, %c0_2] : memref<24x1xi32, #tpu.memory_space<vmem>>, vector<24x1xi32>
    %c0_3 = arith.constant 0 : index
    %c0_4 = arith.constant 0 : index
    %2 = vector.load %arg3[%c0_3, %c0_4] : memref<1x32xf32, #tpu.memory_space<vmem>>, vector<1x32xf32>
    %3 = tpu.iota {dimensions = array<i32: 1>} : vector<24x32xi32>
    %4 = vector.broadcast %1 : vector<24x1xi32> to vector<24x32xi32>
    %5 = arith.cmpi eq, %3, %4 : vector<24x32xi32>
    %6 = arith.extui %5 : vector<24x32xi1> to vector<24x32xi32>
    %7 = arith.sitofp %6 : vector<24x32xi32> to vector<24x32xf32>
    %8 = vector.broadcast %2 : vector<1x32xf32> to vector<24x32xf32>
    %9 = arith.mulf %7, %8 : vector<24x32xf32>
    %10 = arith.subf %0, %9 : vector<24x32xf32>
    %cst = arith.constant 3.000000e+01 : f32
    %11 = vector.broadcast %cst : f32 to vector<24x32xf32>
    %12 = arith.mulf %11, %10 : vector<24x32xf32>
    %cst_5 = arith.constant dense<0xFF800000> : vector<24xf32>
    %13 = vector.multi_reduction <maximumf>, %12, %cst_5 [1] : vector<24x32xf32> to vector<24xf32>
    %14 = vector.shape_cast %13 : vector<24xf32> to vector<24x1xf32>
    %15 = vector.broadcast %14 : vector<24x1xf32> to vector<24x32xf32>
    %16 = arith.subf %12, %15 : vector<24x32xf32>
    %17 = math.exp %16 : vector<24x32xf32>
    %cst_6 = arith.constant dense<0.000000e+00> : vector<24xf32>
    %18 = vector.multi_reduction <add>, %17, %cst_6 [1] : vector<24x32xf32> to vector<24xf32>
    %19 = vector.shape_cast %18 : vector<24xf32> to vector<24x1xf32>
    %20 = math.log %19 : vector<24x1xf32>
    %21 = arith.addf %14, %20 : vector<24x1xf32>
    %22 = arith.mulf %7, %12 : vector<24x32xf32>
    %cst_7 = arith.constant dense<0.000000e+00> : vector<24xf32>
    %23 = vector.multi_reduction <add>, %22, %cst_7 [1] : vector<24x32xf32> to vector<24xf32>
    %24 = vector.shape_cast %23 : vector<24xf32> to vector<24x1xf32>
    %25 = arith.subf %21, %24 : vector<24x1xf32>
    %c0_8 = arith.constant 0 : index
    %c0_9 = arith.constant 0 : index
    %26 = vector.load %arg4[%c0_8, %c0_9] : memref<24x1xf32, #tpu.memory_space<vmem>>, vector<24x1xf32>
    tpu.vector_store %arg4[%c0_8, %c0_9], %25 {strides = array<i32>} : memref<24x1xf32, #tpu.memory_space<vmem>>, vector<24x1xf32>,
    return
  }
  func.func @transform_0(%arg0: i32) -> (i32, i32) {
    %c0_i32 = arith.constant 0 : i32
    %c0_i32_0 = arith.constant 0 : i32
    return %arg0, %c0_i32 : i32, i32
  }
  func.func @transform_1(%arg0: i32) -> (i32, i32) {
    %c0_i32 = arith.constant 0 : i32
    %c0_i32_0 = arith.constant 0 : i32
    return %arg0, %c0_i32 : i32, i32
  }
  func.func @transform_2(%arg0: i32) -> (i32, i32) {
    %c0_i32 = arith.constant 0 : i32
    %c0_i32_0 = arith.constant 0 : i32
    %c0_i32_1 = arith.constant 0 : i32
    return %c0_i32, %c0_i32_0 : i32, i32
  }
  func.func @transform_3(%arg0: i32) -> (i32, i32) {
    %c0_i32 = arith.constant 0 : i32
    %c0_i32_0 = arith.constant 0 : i32
    return %arg0, %c0_i32 : i32, i32
  }
}

</mosaic_0001>

<bundles_post_ra>
// kernel: tpu_custom_call.1
= control target key start
LH: loop header
LB: loop body
LE: loop exit
PB: predicated region body
PF: predicated region fallthrough
CT: control target
= control target key end

     0   :  { %v136_v0 = vmov 0   ;;  %v21_v4 = vlaneseq  ;;  %v137_v10 = vmov 0.0   ;;  %vm56_vm3 = vcmask 261120   ;;  %s197_s1 = inlined_call_operand.vmem [shape: s32[24,1], index: 1, kind: input, shape index: {}]   ;;  %s198_s2 = inlined_call_operand.vmem [shape: f32[1,32], index: 2, kind: input, shape index: {}]   ;;  %s199_s0 = inlined_call_operand.vmem [shape: f32[24,32], index: 0, kind: input, shape index: {}]   ;;  %s200_s3 = inlined_call_operand.vmem [shape: f32[24,1], index: 3, kind: output, shape index: {}]  }
   0x1   :  { %122 = vset.pattern.permute.xlu0 %v136_v0  ;;  %v17_v1 = vld [vmem:[%s197_s1] sm:$0xff]  ;;  %123 = vset.pattern.permute.xlu1 %v136_v0  ;;  %v19_v2 = vld [vmem:[%s197_s1 + $0x10] sm:$0xff]  ;;  %v18_v3 = vld [vmem:[%s197_s1 + $0x8] sm:$0xff]  ;;  %vm108_vm4 = vcmask 7168  }
   0x2   :  { %24 = vperm.xlu0 %122, %v17_v1   ;;  %30 = vperm.xlu1 %123, %v19_v2   ;;  %v22_v5 = vand.u32 127, %v21_v4  ;;  %v119_v6 = vld [vmem:[%s198_s2] ss:$0 sm:$0xff]  ;;  %v16_v17 = vld [vmem:[%s199_s0 + $0x10] sm:$0xff]  ;;  %v15_v18 = vld [vmem:[%s199_s0 + $0x8] sm:$0xff] }
   0x3   :  { %v14_v9 = vld [vmem:[%s199_s0] sm:$0xff] }
   0x6   :  { %27 = vperm.xlu0 %122, %v18_v3  }
  0x81   :  { %v25_v7 = vpop.permute.xlu0 %24  ;;  %v31_v8 = vpop.permute.xlu1 %30 }
  0x82   :  { %vm32_vm0 = vcmp.eq.s32.totalorder %v22_v5, %v25_v7  ;;  %vm34_vm1 = vcmp.eq.s32.totalorder %v22_v5, %v31_v8 }
  0x83   :  { %v116_v11 = vsel %vm32_vm0, 1.0, %v137_v10  ;;  %v118_v12 = vsel %vm34_vm1, 1.0, %v137_v10 }
  0x84   :  { %v47_v13 = vmul.f32 %v119_v6, %v116_v11  ;;  %v49_v16 = vmul.f32 %v119_v6, %v118_v12 }
  0x85   :  { %v28_v14 = vpop.permute.xlu0 %27 }
  0x86   :  { %v50_v15 = vsub.f32 %v14_v9, %v47_v13  ;;  %vm33_vm2 = vcmp.eq.s32.totalorder %v22_v5, %v28_v14  ;;  %v52_v22 = vsub.f32 %v16_v17, %v49_v16 }
  0x87   :  { %v117_v19 = vsel %vm33_vm2, 1.0, %v137_v10 }
  0x88   :  { %v48_v20 = vmul.f32 %v119_v6, %v117_v19  ;;  %v53_v21 = vmul.f32 30.0, %v50_v15  ;;  %v55_v27 = vmul.f32 30.0, %v52_v22 }
  0x8a   :  { %v51_v23 = vsub.f32 %v15_v18, %v48_v20  ;;  %v57_v24 = vsel %vm56_vm3, %v53_v21, -inf  ;;  %v63_v28 = vsel %vm56_vm3, %v55_v27, -inf  ;;  %v93_v42 = vmul.f32 %v116_v11, %v53_v21 }
  0x8b   :  { %58 = vmax.xlane.f32.xlu1 %v57_v24  ;;  %v95_v46 = vmul.f32 %v118_v12, %v55_v27 }
  0x8c   :  { %v54_v25 = vmul.f32 30.0, %v51_v23  ;;  %v96_v44 = vsel %vm56_vm3, %v93_v42, 0.0 }
  0x8d   :  { %v102_v48 = vsel %vm56_vm3, %v95_v46, 0.0 }
  0x8e   :  { %v60_v26 = vsel %vm56_vm3, %v54_v25, -inf  ;;  %v94_v47 = vmul.f32 %v117_v19, %v54_v25 }
  0x8f   :  { %61 = vmax.xlane.f32.xlu0 %v60_v26 }
  0x90   :  { %v99_v49 = vsel %vm56_vm3, %v94_v47, 0.0 }
  0x93   :  { %64 = vmax.xlane.f32.xlu0 %v63_v28 }
 0x118   :  { %v59_v29 = vpop.xlane.xlu1 %58 }
 0x119   :  { %v66_v30 = vsub.f32 %v53_v21, %v59_v29 }
 0x11b   :  { %v69_v31 = vmul.f32 1.442695, %v66_v30 }
 0x11c   :  { %v62_v32 = vpop.xlane.xlu0 %61 }
 0x11d   :  { %124 = vpow2.f32 %v69_v31  ;;  %v67_v33 = vsub.f32 %v54_v25, %v62_v32 }
 0x11f   :  { %v71_v34 = vmul.f32 1.442695, %v67_v33 }
 0x120   :  { %v65_v35 = vpop.xlane.xlu0 %64 }
 0x121   :  { %126 = vpow2.f32 %v71_v34  ;;  %v68_v36 = vsub.f32 %v55_v27, %v65_v35 }
 0x123   :  { %v73_v37 = vmul.f32 1.442695, %v68_v36 }
 0x125   :  { %128 = vpow2.f32 %v73_v37 }
 0x127   :  { %v125_v38 = vpop.eup %124 }
 0x128   :  { %v75_v39 = vsel %vm56_vm3, %v125_v38, 0.0 }
 0x129   :  { %76 = vadd.xlane.f32.xlu1 %v75_v39 }
 0x12b   :  { %v127_v40 = vpop.eup %126 }
 0x12c   :  { %v78_v41 = vsel %vm56_vm3, %v127_v40, 0.0 }
 0x12d   :  { %79 = vadd.xlane.f32.xlu0 %v78_v41 }
 0x12f   :  { %v129_v43 = vpop.eup %128 }
 0x130   :  { %v81_v45 = vsel %vm56_vm3, %v129_v43, 0.0 }
 0x131   :  { %97 = vadd.xlane.f32.xlu0 %v96_v44  ;;  %82 = vadd.xlane.f32.xlu1 %v81_v45 }
 0x135   :  { %103 = vadd.xlane.f32.xlu0 %v102_v48  ;;  %100 = vadd.xlane.f32.xlu1 %v99_v49 }
 0x1b6   :  { %v77_v50 = vpop.xlane.xlu1 %76 }
 0x1b7   :  { %130 = vlog2.f32 %v77_v50 }
 0x1ba   :  { %v80_v51 = vpop.xlane.xlu0 %79 }
 0x1bb   :  { %132 = vlog2.f32 %v80_v51 }
 0x1be   :  { %v83_v52 = vpop.xlane.xlu1 %82  ;;  %v98_v57 = vpop.xlane.xlu0 %97 }
 0x1bf   :  { %134 = vlog2.f32 %v83_v52 }
 0x1c1   :  { %v131_v53 = vpop.eup %130 }
 0x1c2   :  { %v85_v54 = vmul.f32 0.6931472, %v131_v53  ;;  %v101_v62 = vpop.xlane.xlu1 %100  ;;  %v104_v2 = vpop.xlane.xlu0 %103 }
 0x1c4   :  { %v90_v55 = vadd.f32 %v85_v54, %v59_v29 }
 0x1c5   :  { %v133_v56 = vpop.eup %132 }
 0x1c6   :  { %v87_v58 = vmul.f32 0.6931472, %v133_v56  ;;  %v105_v59 = vsub.f32 %v90_v55, %v98_v57 }
 0x1c8   :  { %109 = vst.msk [vmem:[%s200_s3] sm:$0xff] %vm108_vm4, %v105_v59  ;;  %v91_v60 = vadd.f32 %v87_v58, %v62_v32 }
 0x1c9   :  { %v135_v61 = vpop.eup %134 }
 0x1ca   :  { %v89_v63 = vmul.f32 0.6931472, %v135_v61  ;;  %v106_v0 = vsub.f32 %v91_v60, %v101_v62 }
 0x1cc   :  { %v92_v1 = vadd.f32 %v89_v63, %v65_v35  ;;  %110 = vst.msk [vmem:[%s200_s3 + $0x8] sm:$0xff] %vm108_vm4, %v106_v0 }
 0x1ce   :  { %v107_v3 = vsub.f32 %v92_v1, %v104_v2 }
 0x1d0   :  { %111 = vst.msk [vmem:[%s200_s3 + $0x10] sm:$0xff] %vm108_vm4, %v107_v3 }

</bundles_post_ra>
